<compile_context>
chip_gen: v7x
topology: tpu7x:2x2x1
jax: 0.10.0
libtpu: 0.0.40
codegen_flags: <defaults>
</compile_context>

<pallas_src>
import functools

import jax
import jax.numpy as jnp
from jax.experimental import pallas as pl
from jax.experimental.pallas import tpu as pltpu

BN_EPS = 1e-5
_VMEM = pl.BlockSpec(memory_space=pltpu.MemorySpace.VMEM)
_COMPILER_PARAMS = pltpu.CompilerParams(vmem_limit_bytes=32 * 1024 * 1024)


# -----------------------------------------------------------------------------
# Fused two-layer kernel: (conv k=s) -> ReLU -> BN -> (conv k=s) -> ReLU -> BN
# Everything in the transposed "channels x pixels" orientation.
# -----------------------------------------------------------------------------
def fused_two_layer_kernel(x_ref, w1_ref, b1_ref, g1_ref, be1_ref,
                           w2_ref, b2_ref, g2_ref, be2_ref, o_ref):
    # x_ref : (G, K1, M2) bf16  layer-1 patches; G = k2*k2 spatial groups,
    #                           K1 = C0*k1*k1, M2 = N*H2*W2 (layer-2 pixels)
    # w1_ref: (C1, K1)    bf16  layer-1 weight, K ordered (c0, kh1, kw1)
    # w2_ref: (G, C2, C1) bf16  layer-2 weight, grouped by (kh2, kw2)
    # b/g/be: (C, 1)      f32   bias / BN gamma / BN beta (column vectors)
    # o_ref : (C2, M2)    f32   normalized layer-2 output
    G, _, M2 = x_ref.shape
    C1 = w1_ref.shape[0]
    C2 = w2_ref.shape[1]

    w1 = w1_ref[...]
    b1 = b1_ref[...]

    # ---- layer 1: per-group matmul + bias + ReLU with fused BN statistics ----
    y1 = []
    s1 = jnp.zeros((C1, 1), jnp.float32)
    q1 = jnp.zeros((C1, 1), jnp.float32)
    for g in range(G):                                   # static unroll (G = 4)
        yg = jnp.dot(w1, x_ref[g], preferred_element_type=jnp.float32) + b1
        yg = jnp.maximum(yg, 0.0)                        # ReLU
        s1 = s1 + jnp.sum(yg, axis=1, keepdims=True)
        q1 = q1 + jnp.sum(yg * yg, axis=1, keepdims=True)
        y1.append(yg)

    inv_m1 = 1.0 / float(G * M2)                         # stats over all N*H1*W1
    mean1 = s1 * inv_m1
    var1 = q1 * inv_m1 - mean1 * mean1
    scale1 = g1_ref[...] * jax.lax.rsqrt(var1 + BN_EPS)
    shift1 = be1_ref[...] - mean1 * scale1

    # ---- layer 2: accumulate the K2 = G*C1 contraction group by group ----
    acc = jnp.zeros((C2, M2), jnp.float32)
    for g in range(G):
        y1n = (y1[g] * scale1 + shift1).astype(jnp.bfloat16)   # BN1 applied
        acc = acc + jnp.dot(w2_ref[g], y1n, preferred_element_type=jnp.float32)

    y2 = jnp.maximum(acc + b2_ref[...], 0.0)             # bias + ReLU
    mean2 = jnp.mean(y2, axis=1, keepdims=True)
    var2 = jnp.mean(y2 * y2, axis=1, keepdims=True) - mean2 * mean2
    scale2 = g2_ref[...] * jax.lax.rsqrt(var2 + BN_EPS)
    shift2 = be2_ref[...] - mean2 * scale2
    o_ref[...] = y2 * scale2 + shift2


def _run_fused_two_layer(x1g, w1t, b1, g1, be1, w2g, b2, g2, be2):
    _, _, M2 = x1g.shape
    C2 = w2g.shape[1]
    return pl.pallas_call(
        fused_two_layer_kernel,
        out_shape=jax.ShapeDtypeStruct((C2, M2), jnp.float32),
        in_specs=[_VMEM] * 9,
        out_specs=_VMEM,
        compiler_params=_COMPILER_PARAMS,
    )(x1g, w1t, b1, g1, be1, w2g, b2, g2, be2)


# -----------------------------------------------------------------------------
# Generic single-layer kernel (fallback / cross-check): matmul + bias + ReLU + BN
# in the same transposed orientation.
# -----------------------------------------------------------------------------
def conv_layer_t_kernel(xt_ref, w_ref, b_ref, g_ref, be_ref, o_ref):
    # xt_ref: (K, M) bf16 patches^T ; w_ref: (Cout, K) bf16 ; b/g/be: (Cout, 1) f32
    # o_ref : (Cout, M) f32 -- lanes = pixels, sublanes = channels
    y = jnp.dot(w_ref[...], xt_ref[...], preferred_element_type=jnp.float32)
    y = jnp.maximum(y + b_ref[...], 0.0)
    mean = jnp.mean(y, axis=1, keepdims=True)
    var = jnp.mean(y * y, axis=1, keepdims=True) - mean * mean
    scale = g_ref[...] * jax.lax.rsqrt(var + BN_EPS)
    shift = be_ref[...] - mean * scale
    o_ref[...] = y * scale + shift


def _run_conv_layer_t(xt, w_mat, b, g, be):
    C_out = w_mat.shape[0]
    M = xt.shape[1]
    return pl.pallas_call(
        conv_layer_t_kernel,
        out_shape=jax.ShapeDtypeStruct((C_out, M), jnp.float32),
        in_specs=[_VMEM] * 5,
        out_specs=_VMEM,
        compiler_params=_COMPILER_PARAMS,
    )(xt, w_mat, b, g, be)


# -----------------------------------------------------------------------------
# Host-side glue
# -----------------------------------------------------------------------------
def _col(v):
    return v.reshape(-1, 1).astype(jnp.float32)


def im2col_T(x, k, s):
    """NCHW x -> X^T (C*k*k, N*Ho*Wo); K ordered (c,kh,kw), M ordered (n,ho,wo)."""
    N, C, H, W = x.shape
    Ho = (H - k) // s + 1
    Wo = (W - k) // s + 1
    if s == k and H == Ho * k and W == Wo * k:
        # non-overlapping patches: pure reshape + transpose, no data duplication
        p = x.reshape(N, C, Ho, k, Wo, k)
        p = jnp.transpose(p, (1, 3, 5, 0, 2, 4))       # (C, kh, kw, N, Ho, Wo)
    else:
        cols = [x[:, :, i:i + s * Ho:s, j:j + s * Wo:s]
                for i in range(k) for j in range(k)]
        p = jnp.stack(cols, axis=0).reshape(k, k, N, C, Ho, Wo)
        p = jnp.transpose(p, (3, 0, 1, 2, 4, 5))       # (C, kh, kw, N, Ho, Wo)
    return p.reshape(C * k * k, N * Ho * Wo), (N, Ho, Wo)


@functools.partial(jax.jit, static_argnames=("k1", "k2"))
def _fused_forward(x, w1, b1, g1, be1, w2, b2, g2, be2, *, k1, k2):
    N, C0, H, W = x.shape
    C1, C2 = w1.shape[0], w2.shape[0]
    H2, W2 = H // (k1 * k2), W // (k1 * k2)
    G = k2 * k2
    M2 = N * H2 * W2
    # x -> (G, K1, M2): group = (kh2, kw2); K1 = (c0, kh1, kw1); M2 = (n, ho2, wo2)
    xr = x.reshape(N, C0, H2, k2, k1, W2, k2, k1)
    xr = jnp.transpose(xr, (3, 6, 1, 4, 7, 0, 2, 5))
    x1g = xr.reshape(G, C0 * k1 * k1, M2).astype(jnp.bfloat16)
    w1t = w1.reshape(C1, C0 * k1 * k1).astype(jnp.bfloat16)
    w2g = jnp.transpose(w2, (2, 3, 0, 1)).reshape(G, C2, C1).astype(jnp.bfloat16)
    o = _run_fused_two_layer(x1g, w1t, _col(b1), _col(g1), _col(be1),
                             w2g, _col(b2), _col(g2), _col(be2))      # (C2, M2)
    # (C2, N, H2*W2) -> (N, C2, H2*W2) -> (N, C2*H2*W2)  == y.view(N, -1) on NCHW
    return jnp.transpose(o.reshape(C2, N, H2 * W2), (1, 0, 2)).reshape(N, -1)


def conv_body_forward_layerwise(x, params):
    """Fallback path: one fused conv+ReLU+BN Pallas kernel per layer."""
    for p in params:
        k, s = p["kernel"], p["stride"]
        c_out = p["w"].shape[0]
        xt, (N, Ho, Wo) = im2col_T(x, k, s)
        y = _run_conv_layer_t(xt.astype(jnp.bfloat16),
                              p["w"].reshape(c_out, -1).astype(jnp.bfloat16),
                              _col(p["b"]), _col(p["gamma"]), _col(p["beta"]))
        x = jnp.transpose(y.reshape(c_out, N, Ho, Wo), (1, 0, 2, 3))   # NCHW
    return x.reshape(x.shape[0], -1)


def conv_body_forward(x, params):
    """x: (N, C, H, W) f32 -> (N, latent_dim) f32."""
    kprod = 1
    for p in params:
        kprod *= p["kernel"]
    if (len(params) == 2
            and all(p["kernel"] == p["stride"] for p in params)
            and x.shape[2] % kprod == 0 and x.shape[3] % kprod == 0):
        p1, p2 = params
        return _fused_forward(x, p1["w"], p1["b"], p1["gamma"], p1["beta"],
                              p2["w"], p2["b"], p2["gamma"], p2["beta"],
                              k1=p1["kernel"], k2=p2["kernel"])
    return conv_body_forward_layerwise(x, params)


def init_conv_body_params(key, in_channels, conv_layer_sizes):
    """Deterministic parameter init mimicking the PyTorch module's shapes."""
    params = []
    c_in = in_channels
    for (c_out, k, s) in conv_layer_sizes:
        key, kw, kb = jax.random.split(key, 3)
        params.append(dict(
            w=0.1 * jax.random.normal(kw, (c_out, c_in, k, k), dtype=jnp.float32),
            b=0.1 * jax.random.normal(kb, (c_out,), dtype=jnp.float32),
            gamma=jnp.ones((c_out,), jnp.float32),     # BatchNorm2d default weight
            beta=jnp.zeros((c_out,), jnp.float32),     # BatchNorm2d default bias
            kernel=k, stride=s))
        c_in = c_out
    return params


if __name__ == "__main__":
    key = jax.random.PRNGKey(0)
    key, kx = jax.random.split(key)

    # obs_dim = (C, H, W); each (k=2, s=2) conv halves spatial, grows channels
    obs_dim = (4, 16, 16)
    conv_layer_sizes = [(8, 2, 2), (16, 2, 2)]
    batch = 2

    x = jax.random.normal(kx, (batch,) + obs_dim, dtype=jnp.float32)   # NCHW
    params = init_conv_body_params(key, obs_dim[0], conv_layer_sizes)

    out = conv_body_forward(x, params)                  # fused single-kernel path
    out_ref = conv_body_forward_layerwise(x, params)    # per-layer kernels (check)
    out, out_ref = jax.block_until_ready((out, out_ref))

    # latent_dim check: 16 channels * 4 * 4 spatial = 256
    expected_latent = 16 * 4 * 4
    assert out.shape == (batch, expected_latent), out.shape
    assert bool(jnp.all(jnp.isfinite(out)))
    assert bool(jnp.allclose(out, out_ref, rtol=2e-2, atol=2e-2)), \
        float(jnp.max(jnp.abs(out - out_ref)))
    print("KERNEL_OK")
</pallas_src>

<mosaic_0001>
module attributes {stable_mosaic.version = 11 : i64} {
  func.func @fused_two_layer_kernel(%arg0: memref<4x16x32xbf16, #tpu.memory_space<vmem>>, %arg1: memref<8x16xbf16, #tpu.memory_space<vmem>>, %arg2: memref<8x1xf32, #tpu.memory_space<vmem>>, %arg3: memref<8x1xf32, #tpu.memory_space<vmem>>, %arg4: memref<8x1xf32, #tpu.memory_space<vmem>>, %arg5: memref<4x16x8xbf16, #tpu.memory_space<vmem>>, %arg6: memref<16x1xf32, #tpu.memory_space<vmem>>, %arg7: memref<16x1xf32, #tpu.memory_space<vmem>>, %arg8: memref<16x1xf32, #tpu.memory_space<vmem>>, %arg9: memref<16x32xf32, #tpu.memory_space<vmem>>) attributes {dimension_semantics = [], scalar_prefetch = 0 : i64, scratch_operands = 0 : i64, tpu.core_type = #tpu.core_type<tc>} {
    %c0 = arith.constant 0 : index
    %c0_0 = arith.constant 0 : index
    %0 = vector.load %arg1[%c0, %c0_0] : memref<8x16xbf16, #tpu.memory_space<vmem>>, vector<8x16xbf16>
    %c0_1 = arith.constant 0 : index
    %c0_2 = arith.constant 0 : index
    %1 = vector.load %arg2[%c0_1, %c0_2] : memref<8x1xf32, #tpu.memory_space<vmem>>, vector<8x1xf32>
    %cst = arith.constant 0.000000e+00 : f32
    %2 = vector.broadcast %cst : f32 to vector<8x1xf32>
    %cst_3 = arith.constant 0.000000e+00 : f32
    %3 = vector.broadcast %cst_3 : f32 to vector<8x1xf32>
    %c0_4 = arith.constant 0 : index
    %c0_5 = arith.constant 0 : index
    %c0_6 = arith.constant 0 : index
    %4 = vector.load %arg0[%c0_4, %c0_5, %c0_6] : memref<4x16x32xbf16, #tpu.memory_space<vmem>>, vector<1x16x32xbf16>
    %5 = vector.shape_cast %4 : vector<1x16x32xbf16> to vector<16x32xbf16>
    %cst_7 = arith.constant dense<0.000000e+00> : vector<8x32xf32>
    %6 = tpu.matmul %0, %5, %cst_7 {dimension_numbers = #tpu.dot_dimension_numbers<[1], [0], [0], [1], [0, 0, 1, 1], [], []>} : vector<8x16xbf16>, vector<16x32xbf16>, vector<8x32xf32> -> vector<8x32xf32>
    %7 = vector.broadcast %1 : vector<8x1xf32> to vector<8x32xf32>
    %8 = arith.addf %6, %7 : vector<8x32xf32>
    %cst_8 = arith.constant 0.000000e+00 : f32
    %9 = vector.broadcast %cst_8 : f32 to vector<8x32xf32>
    %10 = arith.maximumf %8, %9 : vector<8x32xf32>
    %cst_9 = arith.constant dense<0.000000e+00> : vector<8xf32>
    %11 = vector.multi_reduction <add>, %10, %cst_9 [1] : vector<8x32xf32> to vector<8xf32>
    %12 = vector.shape_cast %11 : vector<8xf32> to vector<8x1xf32>
    %13 = arith.addf %2, %12 : vector<8x1xf32>
    %14 = arith.mulf %10, %10 : vector<8x32xf32>
    %cst_10 = arith.constant dense<0.000000e+00> : vector<8xf32>
    %15 = vector.multi_reduction <add>, %14, %cst_10 [1] : vector<8x32xf32> to vector<8xf32>
    %16 = vector.shape_cast %15 : vector<8xf32> to vector<8x1xf32>
    %17 = arith.addf %3, %16 : vector<8x1xf32>
    %c1 = arith.constant 1 : index
    %c0_11 = arith.constant 0 : index
    %c0_12 = arith.constant 0 : index
    %18 = vector.load %arg0[%c1, %c0_11, %c0_12] : memref<4x16x32xbf16, #tpu.memory_space<vmem>>, vector<1x16x32xbf16>
    %19 = vector.shape_cast %18 : vector<1x16x32xbf16> to vector<16x32xbf16>
    %cst_13 = arith.constant dense<0.000000e+00> : vector<8x32xf32>
    %20 = tpu.matmul %0, %19, %cst_13 {dimension_numbers = #tpu.dot_dimension_numbers<[1], [0], [0], [1], [0, 0, 1, 1], [], []>} : vector<8x16xbf16>, vector<16x32xbf16>, vector<8x32xf32> -> vector<8x32xf32>
    %21 = vector.broadcast %1 : vector<8x1xf32> to vector<8x32xf32>
    %22 = arith.addf %20, %21 : vector<8x32xf32>
    %cst_14 = arith.constant 0.000000e+00 : f32
    %23 = vector.broadcast %cst_14 : f32 to vector<8x32xf32>
    %24 = arith.maximumf %22, %23 : vector<8x32xf32>
    %cst_15 = arith.constant dense<0.000000e+00> : vector<8xf32>
    %25 = vector.multi_reduction <add>, %24, %cst_15 [1] : vector<8x32xf32> to vector<8xf32>
    %26 = vector.shape_cast %25 : vector<8xf32> to vector<8x1xf32>
    %27 = arith.addf %13, %26 : vector<8x1xf32>
    %28 = arith.mulf %24, %24 : vector<8x32xf32>
    %cst_16 = arith.constant dense<0.000000e+00> : vector<8xf32>
    %29 = vector.multi_reduction <add>, %28, %cst_16 [1] : vector<8x32xf32> to vector<8xf32>
    %30 = vector.shape_cast %29 : vector<8xf32> to vector<8x1xf32>
    %31 = arith.addf %17, %30 : vector<8x1xf32>
    %c2 = arith.constant 2 : index
    %c0_17 = arith.constant 0 : index
    %c0_18 = arith.constant 0 : index
    %32 = vector.load %arg0[%c2, %c0_17, %c0_18] : memref<4x16x32xbf16, #tpu.memory_space<vmem>>, vector<1x16x32xbf16>
    %33 = vector.shape_cast %32 : vector<1x16x32xbf16> to vector<16x32xbf16>
    %cst_19 = arith.constant dense<0.000000e+00> : vector<8x32xf32>
    %34 = tpu.matmul %0, %33, %cst_19 {dimension_numbers = #tpu.dot_dimension_numbers<[1], [0], [0], [1], [0, 0, 1, 1], [], []>} : vector<8x16xbf16>, vector<16x32xbf16>, vector<8x32xf32> -> vector<8x32xf32>
    %35 = vector.broadcast %1 : vector<8x1xf32> to vector<8x32xf32>
    %36 = arith.addf %34, %35 : vector<8x32xf32>
    %cst_20 = arith.constant 0.000000e+00 : f32
    %37 = vector.broadcast %cst_20 : f32 to vector<8x32xf32>
    %38 = arith.maximumf %36, %37 : vector<8x32xf32>
    %cst_21 = arith.constant dense<0.000000e+00> : vector<8xf32>
    %39 = vector.multi_reduction <add>, %38, %cst_21 [1] : vector<8x32xf32> to vector<8xf32>
    %40 = vector.shape_cast %39 : vector<8xf32> to vector<8x1xf32>
    %41 = arith.addf %27, %40 : vector<8x1xf32>
    %42 = arith.mulf %38, %38 : vector<8x32xf32>
    %cst_22 = arith.constant dense<0.000000e+00> : vector<8xf32>
    %43 = vector.multi_reduction <add>, %42, %cst_22 [1] : vector<8x32xf32> to vector<8xf32>
    %44 = vector.shape_cast %43 : vector<8xf32> to vector<8x1xf32>
    %45 = arith.addf %31, %44 : vector<8x1xf32>
    %c3 = arith.constant 3 : index
    %c0_23 = arith.constant 0 : index
    %c0_24 = arith.constant 0 : index
    %46 = vector.load %arg0[%c3, %c0_23, %c0_24] : memref<4x16x32xbf16, #tpu.memory_space<vmem>>, vector<1x16x32xbf16>
    %47 = vector.shape_cast %46 : vector<1x16x32xbf16> to vector<16x32xbf16>
    %cst_25 = arith.constant dense<0.000000e+00> : vector<8x32xf32>
    %48 = tpu.matmul %0, %47, %cst_25 {dimension_numbers = #tpu.dot_dimension_numbers<[1], [0], [0], [1], [0, 0, 1, 1], [], []>} : vector<8x16xbf16>, vector<16x32xbf16>, vector<8x32xf32> -> vector<8x32xf32>
    %49 = vector.broadcast %1 : vector<8x1xf32> to vector<8x32xf32>
    %50 = arith.addf %48, %49 : vector<8x32xf32>
    %cst_26 = arith.constant 0.000000e+00 : f32
    %51 = vector.broadcast %cst_26 : f32 to vector<8x32xf32>
    %52 = arith.maximumf %50, %51 : vector<8x32xf32>
    %cst_27 = arith.constant dense<0.000000e+00> : vector<8xf32>
    %53 = vector.multi_reduction <add>, %52, %cst_27 [1] : vector<8x32xf32> to vector<8xf32>
    %54 = vector.shape_cast %53 : vector<8xf32> to vector<8x1xf32>
    %55 = arith.addf %41, %54 : vector<8x1xf32>
    %56 = arith.mulf %52, %52 : vector<8x32xf32>
    %cst_28 = arith.constant dense<0.000000e+00> : vector<8xf32>
    %57 = vector.multi_reduction <add>, %56, %cst_28 [1] : vector<8x32xf32> to vector<8xf32>
    %58 = vector.shape_cast %57 : vector<8xf32> to vector<8x1xf32>
    %59 = arith.addf %45, %58 : vector<8x1xf32>
    %cst_29 = arith.constant 7.812500e-03 : f32
    %60 = vector.broadcast %cst_29 : f32 to vector<8x1xf32>
    %61 = arith.mulf %55, %60 : vector<8x1xf32>
    %cst_30 = arith.constant 7.812500e-03 : f32
    %62 = vector.broadcast %cst_30 : f32 to vector<8x1xf32>
    %63 = arith.mulf %59, %62 : vector<8x1xf32>
    %64 = arith.mulf %61, %61 : vector<8x1xf32>
    %65 = arith.subf %63, %64 : vector<8x1xf32>
    %c0_31 = arith.constant 0 : index
    %c0_32 = arith.constant 0 : index
    %66 = vector.load %arg3[%c0_31, %c0_32] : memref<8x1xf32, #tpu.memory_space<vmem>>, vector<8x1xf32>
    %cst_33 = arith.constant 9.99999974E-6 : f32
    %67 = vector.broadcast %cst_33 : f32 to vector<8x1xf32>
    %68 = arith.addf %65, %67 : vector<8x1xf32>
    %69 = math.rsqrt %68 : vector<8x1xf32>
    %70 = arith.mulf %66, %69 : vector<8x1xf32>
    %c0_34 = arith.constant 0 : index
    %c0_35 = arith.constant 0 : index
    %71 = vector.load %arg4[%c0_34, %c0_35] : memref<8x1xf32, #tpu.memory_space<vmem>>, vector<8x1xf32>
    %72 = arith.mulf %61, %70 : vector<8x1xf32>
    %73 = arith.subf %71, %72 : vector<8x1xf32>
    %cst_36 = arith.constant 0.000000e+00 : f32
    %74 = vector.broadcast %cst_36 : f32 to vector<16x32xf32>
    %75 = vector.broadcast %70 : vector<8x1xf32> to vector<8x32xf32>
    %76 = arith.mulf %10, %75 : vector<8x32xf32>
    %77 = vector.broadcast %73 : vector<8x1xf32> to vector<8x32xf32>
    %78 = arith.addf %76, %77 : vector<8x32xf32>
    %79 = arith.truncf %78 : vector<8x32xf32> to vector<8x32xbf16>
    %c0_37 = arith.constant 0 : index
    %c0_38 = arith.constant 0 : index
    %c0_39 = arith.constant 0 : index
    %80 = vector.load %arg5[%c0_37, %c0_38, %c0_39] : memref<4x16x8xbf16, #tpu.memory_space<vmem>>, vector<1x16x8xbf16>
    %81 = vector.shape_cast %80 : vector<1x16x8xbf16> to vector<16x8xbf16>
    %cst_40 = arith.constant dense<0.000000e+00> : vector<16x32xf32>
    %82 = tpu.matmul %81, %79, %cst_40 {dimension_numbers = #tpu.dot_dimension_numbers<[1], [0], [0], [1], [0, 0, 1, 1], [], []>} : vector<16x8xbf16>, vector<8x32xbf16>, vector<16x32xf32> -> vector<16x32xf32>
    %83 = arith.addf %74, %82 : vector<16x32xf32>
    %84 = vector.broadcast %70 : vector<8x1xf32> to vector<8x32xf32>
    %85 = arith.mulf %24, %84 : vector<8x32xf32>
    %86 = vector.broadcast %73 : vector<8x1xf32> to vector<8x32xf32>
    %87 = arith.addf %85, %86 : vector<8x32xf32>
    %88 = arith.truncf %87 : vector<8x32xf32> to vector<8x32xbf16>
    %c1_41 = arith.constant 1 : index
    %c0_42 = arith.constant 0 : index
    %c0_43 = arith.constant 0 : index
    %89 = vector.load %arg5[%c1_41, %c0_42, %c0_43] : memref<4x16x8xbf16, #tpu.memory_space<vmem>>, vector<1x16x8xbf16>
    %90 = vector.shape_cast %89 : vector<1x16x8xbf16> to vector<16x8xbf16>
    %cst_44 = arith.constant dense<0.000000e+00> : vector<16x32xf32>
    %91 = tpu.matmul %90, %88, %cst_44 {dimension_numbers = #tpu.dot_dimension_numbers<[1], [0], [0], [1], [0, 0, 1, 1], [], []>} : vector<16x8xbf16>, vector<8x32xbf16>, vector<16x32xf32> -> vector<16x32xf32>
    %92 = arith.addf %83, %91 : vector<16x32xf32>
    %93 = vector.broadcast %70 : vector<8x1xf32> to vector<8x32xf32>
    %94 = arith.mulf %38, %93 : vector<8x32xf32>
    %95 = vector.broadcast %73 : vector<8x1xf32> to vector<8x32xf32>
    %96 = arith.addf %94, %95 : vector<8x32xf32>
    %97 = arith.truncf %96 : vector<8x32xf32> to vector<8x32xbf16>
    %c2_45 = arith.constant 2 : index
    %c0_46 = arith.constant 0 : index
    %c0_47 = arith.constant 0 : index
    %98 = vector.load %arg5[%c2_45, %c0_46, %c0_47] : memref<4x16x8xbf16, #tpu.memory_space<vmem>>, vector<1x16x8xbf16>
    %99 = vector.shape_cast %98 : vector<1x16x8xbf16> to vector<16x8xbf16>
    %cst_48 = arith.constant dense<0.000000e+00> : vector<16x32xf32>
    %100 = tpu.matmul %99, %97, %cst_48 {dimension_numbers = #tpu.dot_dimension_numbers<[1], [0], [0], [1], [0, 0, 1, 1], [], []>} : vector<16x8xbf16>, vector<8x32xbf16>, vector<16x32xf32> -> vector<16x32xf32>
    %101 = arith.addf %92, %100 : vector<16x32xf32>
    %102 = vector.broadcast %70 : vector<8x1xf32> to vector<8x32xf32>
    %103 = arith.mulf %52, %102 : vector<8x32xf32>
    %104 = vector.broadcast %73 : vector<8x1xf32> to vector<8x32xf32>
    %105 = arith.addf %103, %104 : vector<8x32xf32>
    %106 = arith.truncf %105 : vector<8x32xf32> to vector<8x32xbf16>
    %c3_49 = arith.constant 3 : index
    %c0_50 = arith.constant 0 : index
    %c0_51 = arith.constant 0 : index
    %107 = vector.load %arg5[%c3_49, %c0_50, %c0_51] : memref<4x16x8xbf16, #tpu.memory_space<vmem>>, vector<1x16x8xbf16>
    %108 = vector.shape_cast %107 : vector<1x16x8xbf16> to vector<16x8xbf16>
    %cst_52 = arith.constant dense<0.000000e+00> : vector<16x32xf32>
    %109 = tpu.matmul %108, %106, %cst_52 {dimension_numbers = #tpu.dot_dimension_numbers<[1], [0], [0], [1], [0, 0, 1, 1], [], []>} : vector<16x8xbf16>, vector<8x32xbf16>, vector<16x32xf32> -> vector<16x32xf32>
    %110 = arith.addf %101, %109 : vector<16x32xf32>
    %c0_53 = arith.constant 0 : index
    %c0_54 = arith.constant 0 : index
    %111 = vector.load %arg6[%c0_53, %c0_54] : memref<16x1xf32, #tpu.memory_space<vmem>>, vector<16x1xf32>
    %112 = vector.broadcast %111 : vector<16x1xf32> to vector<16x32xf32>
    %113 = arith.addf %110, %112 : vector<16x32xf32>
    %cst_55 = arith.constant 0.000000e+00 : f32
    %114 = vector.broadcast %cst_55 : f32 to vector<16x32xf32>
    %115 = arith.maximumf %113, %114 : vector<16x32xf32>
    %cst_56 = arith.constant dense<0.000000e+00> : vector<16xf32>
    %116 = vector.multi_reduction <add>, %115, %cst_56 [1] : vector<16x32xf32> to vector<16xf32>
    %117 = vector.shape_cast %116 : vector<16xf32> to vector<16x1xf32>
    %cst_57 = arith.constant 3.200000e+01 : f32
    %118 = vector.broadcast %cst_57 : f32 to vector<16x1xf32>
    %119 = arith.divf %117, %118 : vector<16x1xf32>
    %120 = arith.mulf %115, %115 : vector<16x32xf32>
    %cst_58 = arith.constant dense<0.000000e+00> : vector<16xf32>
    %121 = vector.multi_reduction <add>, %120, %cst_58 [1] : vector<16x32xf32> to vector<16xf32>
    %122 = vector.shape_cast %121 : vector<16xf32> to vector<16x1xf32>
    %cst_59 = arith.constant 3.200000e+01 : f32
    %123 = vector.broadcast %cst_59 : f32 to vector<16x1xf32>
    %124 = arith.divf %122, %123 : vector<16x1xf32>
    %125 = arith.mulf %119, %119 : vector<16x1xf32>
    %126 = arith.subf %124, %125 : vector<16x1xf32>
    %c0_60 = arith.constant 0 : index
    %c0_61 = arith.constant 0 : index
    %127 = vector.load %arg7[%c0_60, %c0_61] : memref<16x1xf32, #tpu.memory_space<vmem>>, vector<16x1xf32>
    %cst_62 = arith.constant 9.99999974E-6 : f32
    %128 = vector.broadcast %cst_62 : f32 to vector<16x1xf32>
    %129 = arith.addf %126, %128 : vector<16x1xf32>
    %130 = math.rsqrt %129 : vector<16x1xf32>
    %131 = arith.mulf %127, %130 : vector<16x1xf32>
    %c0_63 = arith.constant 0 : index
    %c0_64 = arith.constant 0 : index
    %132 = vector.load %arg8[%c0_63, %c0_64] : memref<16x1xf32, #tpu.memory_space<vmem>>, vector<16x1xf32>
    %133 = arith.mulf %119, %131 : vector<16x1xf32>
    %134 = arith.subf %132, %133 : vector<16x1xf32>
    %135 = vector.broadcast %131 : vector<16x1xf32> to vector<16x32xf32>
    %136 = arith.mulf %115, %135 : vector<16x32xf32>
    %137 = vector.broadcast %134 : vector<16x1xf32> to vector<16x32xf32>
    %138 = arith.addf %136, %137 : vector<16x32xf32>
    %c0_65 = arith.constant 0 : index
    %c0_66 = arith.constant 0 : index
    %139 = vector.load %arg9[%c0_65, %c0_66] : memref<16x32xf32, #tpu.memory_space<vmem>>, vector<16x32xf32>
    tpu.vector_store %arg9[%c0_65, %c0_66], %138 {strides = array<i32>} : memref<16x32xf32, #tpu.memory_space<vmem>>, vector<16x32xf32>,
    return
  }
}

</mosaic_0001>

<bundles_post_ra>
// kernel: _fused_forward.1
= control target key start
LH: loop header
LB: loop body
LE: loop exit
PB: predicated region body
PF: predicated region fallthrough
CT: control target
= control target key end

     0   :  { %v732_v0 = vmov 0.0   ;;  %vm733_vm0 = vmmov 0   ;;  %vm48_vm1 = vcmask 130048   ;;  %v734_v4 = vmov 0   ;;  %s903_s0 = inlined_call_operand.vmem [shape: bf16[4,16,32], index: 0, kind: input, shape index: {}]   ;;  %s904_s1 = inlined_call_operand.vmem [shape: bf16[8,16], index: 1, kind: input, shape index: {}]   ;;  %s905_s2 = inlined_call_operand.vmem [shape: f32[8,1], index: 2, kind: input, shape index: {}]   ;;  %s906_s3 = inlined_call_operand.vmem [shape: f32[8,1], index: 3, kind: input, shape index: {}]   ;;  %s907_s4 = inlined_call_operand.vmem [shape: f32[8,1], index: 4, kind: input, shape index: {}]   ;;  %s908_s6 = inlined_call_operand.vmem [shape: f32[16,1], index: 6, kind: input, shape index: {}]   ;;  %s909_s5 = inlined_call_operand.vmem [shape: bf16[4,16,8], index: 5, kind: input, shape index: {}]   ;;  %s910_s7 = inlined_call_operand.vmem [shape: f32[16,1], index: 7, kind: input, shape index: {}]   ;;  %s911_s8 = inlined_call_operand.vmem [shape: f32[16,1], index: 8, kind: input, shape index: {}]   ;;  %s912_s9 = inlined_call_operand.vmem [shape: f32[16,32], index: 9, kind: output, shape index: {}]  }
   0x1   :  { %665 = vmatprep.subr.bf16.mxu0 %v732_v0  ;;  %671 = vmatprep.subr.bf16.mxu1 %v732_v0  ;;  %v718_v1 = vld [vmem:[%s903_s0] sm:$0xff]   ;;  %v719_v2 = vld [vmem:[%s903_s0 + $0x8] sm:$0xff]   ;;  %v720_v5 = vld [vmem:[%s903_s0 + $0x10] sm:$0xff]   ;;  %vm93_vm2 = vcmask 261120   ;;  %vm321_vm3 = vcmask 1043456   ;;  %vm317_vm4 = vcmask 64512  }
   0x2   :  { %667 = vmatprep.mubr.msk.bf16.mxu0 %vm733_vm0, %v732_v0  ;;  %673 = vmatprep.mubr.msk.bf16.mxu1 %vm733_vm0, %v732_v0  ;;  %v33_v3 = vld [vmem:[%s904_s1] sm:$0xf]  ;;  %v721_v6 = vld [vmem:[%s903_s0 + $0x18] sm:$0xff]  }
   0x3   :  { %666 = vmatpush3.bf16.msra.mxu0 %v718_v1  ;;  %716 = vset.pattern.permute.xlu0 %v734_v4  ;;  %v34_v7 = vld [vmem:[%s905_s2] sm:$0xff] }
   0x4   :  { %672 = vmatpush3.bf16.msra.mxu1 %v719_v2  ;;  %677 = vmatprep.subr.bf16.mxu0 %v732_v0  ;;  %v284_v1 = vld [vmem:[%s906_s3] sm:$0xff] }
   0x5   :  { %683 = vmatprep.subr.bf16.mxu1 %v732_v0  ;;  %717 = vset.pattern.permute.xlu1 %v734_v4  ;;  %v288_v4 = vld [vmem:[%s907_s4] sm:$0xff] }
   0x6   :  { %668 = vmatmul.mubr.msk.bf16.vlgmr.msra.gmra.mrb[0].mxu0 %vm48_vm1, %v33_v3  ;;  %39 = vperm.xlu0 %716, %v34_v7  }
   0x7   :  { %674 = vmatmul.mubr.msk.bf16.vlgmr.msra.gmra.mrb[0].mxu1 %vm48_vm1, %v33_v3  ;;  %678 = vmatpush3.bf16.msra.mxu0 %v720_v5 }
   0x8   :  { %684 = vmatpush3.bf16.msra.mxu1 %v721_v6  ;;  %679 = vmatprep.mubr.msk.bf16.mxu0 %vm733_vm0, %v732_v0  ;;  %v538_v6 = vld [vmem:[%s908_s6] sm:$0xff] }
   0x9   :  { %685 = vmatprep.mubr.msk.bf16.mxu1 %vm733_vm0, %v732_v0  ;;  %689 = vmatprep.subr.bf16.mxu0 %v732_v0 }
   0xa   :  { %695 = vmatprep.subr.bf16.mxu1 %v732_v0 }
   0xe   :  { %680 = vmatmul.mubr.msk.bf16.vlgmr.msra.gmra.mrb[4].mxu0 %vm48_vm1, %v33_v3 }
   0xf   :  { %686 = vmatmul.mubr.msk.bf16.vlgmr.msra.gmra.mrb[4].mxu1 %vm48_vm1, %v33_v3  ;;  %691 = vmatprep.mubr.msk.bf16.mxu0 %vm733_vm0, %v732_v0 }
  0x10   :  { %697 = vmatprep.mubr.msk.bf16.mxu1 %vm733_vm0, %v732_v0 }
  0x85   :  { %v40_v8 = vpop.permute.xlu0 %39 }
  0xd9   :  { %v86_v9 = vpop.f32.mrb[0].mxu0 }
  0xda   :  { %v87_v10 = vadd.f32 %v86_v9, %v40_v8  ;;  %v146_v11 = vpop.f32.mrb[0].mxu1  ;;  %v669_v12 = vpop.f32.mrb[1].mxu0 }
  0xdb   :  { %v147_v13 = vadd.f32 %v146_v11, %v40_v8  ;;  %v675_v14 = vpop.f32.mrb[1].mxu1  ;;  %v89_v15 = vpop.f32.mrb[2].mxu0 }
  0xdc   :  { %v825_v16 = vmax.f32 %v87_v10, 0.0  ;;  %v149_v17 = vpop.f32.mrb[2].mxu1  ;;  %v670_v18 = vpop.f32.mrb[3].mxu0 }
  0xdd   :  { %v827_v19 = vmax.f32 %v147_v13, 0.0  ;;  %v676_v20 = vpop.f32.mrb[3].mxu1 }
  0xde   :  { %v94_v21 = vsel %vm93_vm2, %v825_v16, 0.0  ;;  %v98_v23 = vmul.f32 %v825_v16, %v825_v16 }
  0xdf   :  { %v153_v22 = vsel %vm93_vm2, %v827_v19, 0.0  ;;  %95 = vadd.xlane.f32.xlu0 %v94_v21  ;;  %v157_v31 = vmul.f32 %v827_v19, %v827_v19 }
  0xe0   :  { %154 = vadd.xlane.f32.xlu1 %v153_v22  ;;  %v99_v28 = vsel %vm93_vm2, %v98_v23, 0.0 }
  0xe1   :  { %v205_v24 = vpop.f32.mrb[4].mxu0  ;;  %v158_v37 = vsel %vm93_vm2, %v157_v31, 0.0 }
  0xe2   :  { %v264_v25 = vpop.f32.mrb[4].mxu1  ;;  %v681_v26 = vpop.f32.mrb[5].mxu0  ;;  %v206_v27 = vadd.f32 %v205_v24, %v40_v8 }
  0xe3   :  { %v208_v29 = vpop.f32.mrb[6].mxu0  ;;  %v687_v30 = vpop.f32.mrb[5].mxu1  ;;  %v265_v36 = vadd.f32 %v264_v25, %v40_v8  ;;  %v539_v8 = vld [vmem:[%s908_s6 + $0x8] sm:$0xff] }
  0xe4   :  { %100 = vadd.xlane.f32.xlu1 %v99_v28  ;;  %v682_v32 = vpop.f32.mrb[7].mxu0  ;;  %v267_v33 = vpop.f32.mrb[6].mxu1  ;;  %v211_v35 = vmax.f32 %v206_v27, 0.0  ;;  %v724_v29 = vld [vmem:[%s909_s5 + $0x10] sm:$0xff]   ;;  %v725_v30 = vld [vmem:[%s909_s5 + $0x18] sm:$0xff]  }
  0xe5   :  { %v688_v34 = vpop.f32.mrb[7].mxu1  ;;  %v270_v38 = vmax.f32 %v265_v36, 0.0 }
  0xe6   :  { %v212_v39 = vsel %vm93_vm2, %v211_v35, 0.0  ;;  %v216_v41 = vmul.f32 %v211_v35, %v211_v35 }
  0xe7   :  { %v271_v40 = vsel %vm93_vm2, %v270_v38, 0.0  ;;  %v275_v43 = vmul.f32 %v270_v38, %v270_v38 }
  0xe8   :  { %159 = vadd.xlane.f32.xlu1 %v158_v37  ;;  %v217_v42 = vsel %vm93_vm2, %v216_v41, 0.0 }
  0xe9   :  { %v276_v44 = vsel %vm93_vm2, %v275_v43, 0.0 }
  0xec   :  { %213 = vadd.xlane.f32.xlu1 %v212_v39 }
  0xf0   :  { %272 = vadd.xlane.f32.xlu1 %v271_v40 }
  0xf4   :  { %218 = vadd.xlane.f32.xlu1 %v217_v42 }
  0xf8   :  { %277 = vadd.xlane.f32.xlu1 %v276_v44 }
 0x16c   :  { %v96_v48 = vpop.xlane.xlu0 %95 }
 0x16d   :  { %v155_v45 = vpop.xlane.xlu1 %154 }
 0x16e   :  { %v156_v50 = vadd.f32 %v155_v45, %v96_v48 }
 0x171   :  { %v101_v46 = vpop.xlane.xlu1 %100 }
 0x175   :  { %v160_v47 = vpop.xlane.xlu1 %159 }
 0x176   :  { %v161_v55 = vadd.f32 %v160_v47, %v101_v46 }
 0x179   :  { %v214_v49 = vpop.xlane.xlu1 %213 }
 0x17a   :  { %v215_v52 = vadd.f32 %v214_v49, %v156_v50 }
 0x17d   :  { %v273_v51 = vpop.xlane.xlu1 %272 }
 0x17e   :  { %v274_v53 = vadd.f32 %v273_v51, %v215_v52 }
 0x180   :  { %v280_v56 = vmul.f32 0.0078125, %v274_v53 }
 0x181   :  { %v219_v54 = vpop.xlane.xlu1 %218 }
 0x182   :  { %v220_v57 = vadd.f32 %v219_v54, %v161_v55  ;;  %v282_v60 = vmul.f32 %v280_v56, %v280_v56 }
 0x185   :  { %v278_v58 = vpop.xlane.xlu1 %277 }
 0x186   :  { %v279_v59 = vadd.f32 %v278_v58, %v220_v57 }
 0x188   :  { %v281_v61 = vmul.f32 0.0078125, %v279_v59 }
 0x18a   :  { %v283_v62 = vsub.f32 %v281_v61, %v282_v60 }
 0x18c   :  { %v285_v63 = vadd.f32 1e-05, %v283_v62 }
 0x18e   :  { %726 = vrsqrt.f32 %v285_v63 }
 0x198   :  { %v727_v2 = vpop.eup %726 }
 0x199   :  { %v287_v3 = vmul.f32 %v727_v2, %v284_v1 }
 0x19b   :  { %293 = vperm.xlu1 %717, %v287_v3   ;;  %v289_v5 = vmul.f32 %v287_v3, %v280_v56 }
 0x19d   :  { %v290_v7 = vsub.f32 %v288_v4, %v289_v5 }
 0x19f   :  { %542 = vperm.xlu1 %717, %v538_v6   ;;  %299 = vperm.xlu0 %716, %v290_v7  }
 0x1a3   :  { %547 = vperm.xlu1 %717, %v539_v8  }
 0x21a   :  { %v294_v9 = vpop.permute.xlu1 %293 }
 0x21b   :  { %v296_v10 = vmul.f32 %v294_v9, %v825_v16  ;;  %v306_v11 = vmul.f32 %v294_v9, %v827_v19  ;;  %v418_v12 = vmul.f32 %v294_v9, %v211_v35  ;;  %v478_v13 = vmul.f32 %v294_v9, %v270_v38  ;;  %v722_v16 = vld [vmem:[%s909_s5 + $0x8] sm:$0xff]   ;;  %v723_v19 = vld [vmem:[%s909_s5] sm:$0xff]  }
 0x21e   :  { %v300_v14 = vpop.permute.xlu0 %299  ;;  %v543_v40 = vpop.permute.xlu1 %542 }
 0x21f   :  { %v302_v15 = vadd.f32 %v300_v14, %v296_v10  ;;  %v307_v17 = vadd.f32 %v306_v11, %v300_v14  ;;  %v419_v18 = vadd.f32 %v418_v12, %v300_v14  ;;  %v479_v20 = vadd.f32 %v478_v13, %v300_v14 }
 0x221   :  { %v308_v21 = vpack.c.bf16 %v307_v17, %v307_v17  ;;  %v303_v22 = vpack.c.bf16 %v302_v15, %v302_v15  ;;  %v420_v25 = vpack.c.bf16 %v419_v18, %v419_v18  ;;  %v480_v26 = vpack.c.bf16 %v479_v20, %v479_v20  ;;  %v578_v15 = vld [vmem:[%s910_s7 + $0x8] sm:$0xff]  ;;  %v577_v18 = vld [vmem:[%s910_s7] sm:$0xff] }
 0x222   :  { %v548_v54 = vpop.permute.xlu1 %547 }
 0x223   :  { %v323_v23 = vsel %vm321_vm3, %v308_v21, 0  ;;  %v375_v24 = vsel %vm321_vm3, %v303_v22, 0  ;;  %v433_v27 = vsel %vm321_vm3, %v420_v25, 0  ;;  %v493_v28 = vsel %vm321_vm3, %v480_v26, 0 }
 0x224   :  { %690 = vmatpush3.bf16.msra.mxu0 %v323_v23  ;;  %696 = vmatpush3.bf16.msra.mxu1 %v375_v24  ;;  %v586_v24 = vld [vmem:[%s911_s8 + $0x8] sm:$0xff] }
 0x225   :  { %701 = vmatprep.subr.bf16.mxu0 %v732_v0  ;;  %707 = vmatprep.subr.bf16.mxu1 %v732_v0 }
 0x227   :  { %692 = vmatmul.mubr.msk.bf16.vlgmr.msra.gmra.mrb[8].mxu0 %vm317_vm4, %v722_v16  ;;  %698 = vmatmul.mubr.msk.bf16.vlgmr.msra.gmra.mrb[8].mxu1 %vm317_vm4, %v723_v19  ;;  %v585_v16 = vld [vmem:[%s911_s8] sm:$0xff] }
 0x228   :  { %702 = vmatpush3.bf16.msra.mxu0 %v433_v27  ;;  %708 = vmatpush3.bf16.msra.mxu1 %v493_v28 }
 0x229   :  { %703 = vmatprep.mubr.msk.bf16.mxu0 %vm733_vm0, %v732_v0  ;;  %709 = vmatprep.mubr.msk.bf16.mxu1 %vm733_vm0, %v732_v0 }
 0x22f   :  { %704 = vmatmul.mubr.msk.bf16.vlgmr.msra.gmra.mrb[12].mxu0 %vm317_vm4, %v724_v29  ;;  %710 = vmatmul.mubr.msk.bf16.vlgmr.msra.gmra.mrb[12].mxu1 %vm317_vm4, %v725_v30 }
 0x2fa   :  { %v359_v31 = vpop.f32.mrb[8].mxu0  ;;  %v411_v32 = vpop.f32.mrb[8].mxu1 }
 0x2fb   :  { %v693_v33 = vpop.f32.mrb[9].mxu0  ;;  %v412_v34 = vadd.f32 %v411_v32, %v359_v31  ;;  %v699_v35 = vpop.f32.mrb[9].mxu1 }
 0x2fc   :  { %v362_v36 = vpop.f32.mrb[10].mxu0  ;;  %v414_v37 = vpop.f32.mrb[10].mxu1 }
 0x2fd   :  { %v694_v38 = vpop.f32.mrb[11].mxu0  ;;  %v415_v39 = vadd.f32 %v414_v37, %v362_v36  ;;  %v700_v0 = vpop.f32.mrb[11].mxu1 }
 0x302   :  { %v469_v41 = vpop.f32.mrb[12].mxu0  ;;  %v529_v42 = vpop.f32.mrb[12].mxu1 }
 0x303   :  { %v476_v43 = vadd.f32 %v469_v41, %v412_v34  ;;  %v705_v44 = vpop.f32.mrb[13].mxu0  ;;  %v711_v45 = vpop.f32.mrb[13].mxu1 }
 0x304   :  { %v472_v46 = vpop.f32.mrb[14].mxu0  ;;  %v532_v47 = vpop.f32.mrb[14].mxu1 }
 0x305   :  { %v477_v48 = vadd.f32 %v472_v46, %v415_v39  ;;  %v536_v49 = vadd.f32 %v529_v42, %v476_v43  ;;  %v706_v50 = vpop.f32.mrb[15].mxu0  ;;  %v712_v51 = vpop.f32.mrb[15].mxu1 }
 0x307   :  { %v550_v52 = vadd.f32 %v543_v40, %v536_v49  ;;  %v537_v53 = vadd.f32 %v532_v47, %v477_v48 }
 0x309   :  { %v552_v55 = vmax.f32 %v550_v52, 0.0  ;;  %v551_v56 = vadd.f32 %v548_v54, %v537_v53 }
 0x30b   :  { %v553_v57 = vmax.f32 %v551_v56, 0.0  ;;  %v554_v58 = vsel %vm93_vm2, %v552_v55, 0.0  ;;  %v563_v61 = vmul.f32 %v552_v55, %v552_v55 }
 0x30c   :  { %555 = vadd.xlane.f32.xlu1 %v554_v58 }
 0x30d   :  { %v557_v59 = vsel %vm93_vm2, %v553_v57, 0.0  ;;  %v564_v60 = vmul.f32 %v553_v57, %v553_v57  ;;  %v565_v63 = vsel %vm93_vm2, %v563_v61, 0.0 }
 0x30e   :  { %558 = vadd.xlane.f32.xlu0 %v557_v59 }
 0x30f   :  { %v568_v62 = vsel %vm93_vm2, %v564_v60, 0.0 }
 0x310   :  { %569 = vadd.xlane.f32.xlu1 %v568_v62 }
 0x312   :  { %566 = vadd.xlane.f32.xlu0 %v565_v63 }
 0x399   :  { %v556_v1 = vpop.xlane.xlu1 %555 }
 0x39a   :  { %v561_v3 = vmul.f32 0.03125, %v556_v1 }
 0x39b   :  { %v559_v2 = vpop.xlane.xlu0 %558 }
 0x39c   :  { %v562_v4 = vmul.f32 0.03125, %v559_v2  ;;  %v573_v9 = vmul.f32 %v561_v3, %v561_v3 }
 0x39d   :  { %v570_v5 = vpop.xlane.xlu1 %569 }
 0x39e   :  { %v574_v6 = vmul.f32 %v562_v4, %v562_v4  ;;  %v572_v7 = vmul.f32 0.03125, %v570_v5 }
 0x39f   :  { %v567_v8 = vpop.xlane.xlu0 %566 }
 0x3a0   :  { %v576_v10 = vsub.f32 %v572_v7, %v574_v6  ;;  %v571_v11 = vmul.f32 0.03125, %v567_v8 }
 0x3a2   :  { %v580_v12 = vadd.f32 1e-05, %v576_v10  ;;  %v575_v13 = vsub.f32 %v571_v11, %v573_v9 }
 0x3a4   :  { %728 = vrsqrt.f32 %v580_v12  ;;  %v579_v14 = vadd.f32 1e-05, %v575_v13 }
 0x3a6   :  { %730 = vrsqrt.f32 %v579_v14 }
 0x3ae   :  { %v729_v17 = vpop.eup %728 }
 0x3af   :  { %v584_v20 = vmul.f32 %v729_v17, %v578_v15 }
 0x3b0   :  { %v731_v21 = vpop.eup %730 }
 0x3b1   :  { %598 = vperm.xlu1 %717, %v584_v20   ;;  %v583_v22 = vmul.f32 %v731_v21, %v577_v18  ;;  %v588_v23 = vmul.f32 %v584_v20, %v562_v4 }
 0x3b3   :  { %593 = vperm.xlu0 %716, %v583_v22   ;;  %v587_v19 = vmul.f32 %v583_v22, %v561_v3  ;;  %v590_v25 = vsub.f32 %v586_v24, %v588_v23 }
 0x3b5   :  { %v589_v26 = vsub.f32 %v585_v16, %v587_v19 }
 0x3b7   :  { %610 = vperm.xlu0 %716, %v590_v25   ;;  %605 = vperm.xlu1 %717, %v589_v26  }
 0x430   :  { %v599_v27 = vpop.permute.xlu1 %598 }
 0x431   :  { %v602_v29 = vmul.f32 %v599_v27, %v553_v57 }
 0x432   :  { %v594_v28 = vpop.permute.xlu0 %593 }
 0x433   :  { %v601_v30 = vmul.f32 %v594_v28, %v552_v55 }
 0x436   :  { %v611_v31 = vpop.permute.xlu0 %610  ;;  %v606_v32 = vpop.permute.xlu1 %605 }
 0x437   :  { %v614_v33 = vadd.f32 %v611_v31, %v602_v29  ;;  %v613_v34 = vadd.f32 %v606_v32, %v601_v30 }
 0x439   :  { %616 = vst.msk [vmem:[%s912_s9 + $0x8] sm:$0xff] %vm93_vm2, %v614_v33  ;;  %615 = vst.msk [vmem:[%s912_s9] sm:$0xff] %vm93_vm2, %v613_v34 }

</bundles_post_ra>
